<compile_context>
chip_gen: v7x
topology: tpu7x:2x2x1
jax: 0.10.0
libtpu: 0.0.40
codegen_flags: <defaults>
</compile_context>

<pallas_src>
import functools
import math

import numpy as np

import jax
import jax.numpy as jnp
from jax import lax
from jax.experimental import pallas as pl
from jax.experimental.pallas import tpu as pltpu


# ------------------------------ helpers -------------------------------------

def _pick_tile(n, target):
    """Fixed-cap row tile; the cdiv grid handles the ragged tail."""
    return n if n <= target else target


def make_kernel_indices(kernel_size):
    """Matches Box3dAttention._create_kernel_indices. Returns (2, P): row0=x, row1=y."""
    if kernel_size % 2 == 0:
        start, end = -kernel_size // 2, kernel_size // 2
        idx = np.linspace(start + 0.5, end - 0.5, kernel_size)
    else:
        start, end = -(kernel_size - 1) // 2, (kernel_size - 1) // 2
        idx = np.linspace(start, end, kernel_size)
    ii, jj = np.meshgrid(idx, idx, indexing="ij")
    ki = np.stack([jj.reshape(-1), ii.reshape(-1)], axis=0) / kernel_size
    return jnp.asarray(ki, dtype=jnp.float32)


# ------------------------- kernel 1: fused input proj ------------------------

def _input_proj_kernel(src_ref, pos_ref, wv_ref, bv_ref, wqp_ref, bqp_ref,
                       val_ref, proj_ref):
    x = src_ref[...]
    q = x + pos_ref[...]                                    # with_pos_embed fused in
    xb = x.astype(jnp.bfloat16)
    qb = q.astype(jnp.bfloat16)
    val = (jnp.dot(xb, wv_ref[...], preferred_element_type=jnp.float32)
           + bv_ref[...])
    val_ref[...] = val.astype(jnp.bfloat16)                 # bf16 operand downstream
    proj_ref[...] = (jnp.dot(qb, wqp_ref[...], preferred_element_type=jnp.float32)
                     + bqp_ref[...])


def fused_input_proj_pallas(src2d, pos2d, wv, bv, wqp, bqp, *, tm_target=128):
    n, d = src2d.shape
    dqp = wqp.shape[1]
    tm = _pick_tile(n, tm_target)
    return pl.pallas_call(
        _input_proj_kernel,
        grid=(pl.cdiv(n, tm),),
        in_specs=[
            pl.BlockSpec((tm, d), lambda i: (i, 0)),
            pl.BlockSpec((tm, d), lambda i: (i, 0)),
            pl.BlockSpec((d, d), lambda i: (0, 0),
                         pipeline_mode=pl.Buffered(1)),      # resident weight
            pl.BlockSpec((1, d), lambda i: (0, 0)),
            pl.BlockSpec((d, dqp), lambda i: (0, 0),
                         pipeline_mode=pl.Buffered(1)),
            pl.BlockSpec((1, dqp), lambda i: (0, 0)),
        ],
        out_specs=[
            pl.BlockSpec((tm, d), lambda i: (i, 0)),
            pl.BlockSpec((tm, dqp), lambda i: (i, 0)),       # lane-dense (dqp % 128 == 0)
        ],
        out_shape=(jax.ShapeDtypeStruct((n, d), jnp.bfloat16),
                   jax.ShapeDtypeStruct((n, dqp), jnp.float32)),
        compiler_params=pltpu.CompilerParams(
            dimension_semantics=("parallel",),
            vmem_limit_bytes=64 * 1024 * 1024),
    )(src2d, pos2d, wv, bv, wqp, bqp)


# ------ kernel 2: box attention (+ fused glue + out_proj + res + LN1) --------

def _box_attn_kernel(proj_ref, ref_ref, ki_ref, value_ref, src_ref,
                     wo_ref, bo_ref, g1_ref, bb1_ref, o_ref, *,
                     nhead, head_dim, nlevel, npoint, level_shapes, n_attn, eps):
    tq = proj_ref.shape[1]
    lp = nlevel * npoint

    # --- per-query reference-box scalars, (tq, 1) ---
    cx = ref_ref[0, :, 0:1]
    cy = ref_ref[0, :, 1:2]
    bw = ref_ref[0, :, 3:4]
    bl = ref_ref[0, :, 4:5]
    th = ref_ref[0, :, 6:7]
    cos_t = jnp.cos(th)
    sin_t = jnp.sin(th)
    bw8 = bw * 0.125
    bl8 = bl * 0.125

    kix = ki_ref[0:1, :]                                     # (1, P)
    kiy = ki_ref[1:2, :]

    # per-level pixel-index iotas, hoisted out of the head loop (no re-broadcast)
    ixs = [lax.broadcasted_iota(jnp.float32, (1, wl, 1), 1) for (_, wl) in level_shapes]
    iys = [lax.broadcasted_iota(jnp.float32, (1, hl, 1), 1) for (hl, _) in level_shapes]

    att_parts = []
    for h in range(nhead):
        # softmax over (level, point) jointly for this head
        lg = proj_ref[0, :, h * lp:(h + 1) * lp]             # (tq, L*P)
        m = jnp.max(lg, axis=-1, keepdims=True)
        e = jnp.exp(lg - m)
        attn = e * pl.reciprocal(jnp.sum(e, axis=-1, keepdims=True), approx=True)

        # TODO(synk): for production BEV level shapes (e.g. 188x188) the dense
        # (tq, Hl, Wl) triangle-weight matrices must be replaced by spatially
        # tiled levels or a true <=4-tap gather, and the elementwise math moved
        # to a (channels, tq) lane layout; the dense form is only sized for the
        # toy (8,8)/(4,4) levels here.
        amat_lvls = []
        for l, (hl, wl) in enumerate(level_shapes):
            o0 = n_attn + (h * nlevel + l) * 4
            off = proj_ref[0, :, o0:o0 + 4]                  # (tq, 4) predicted offsets
            ctr_x = cx + off[:, 0:1] * bw8
            ctr_y = cy + off[:, 1:2] * bl8
            sz_x = jnp.maximum(bw + off[:, 2:3] * bw8, 0.0)  # relu(box size)
            sz_y = jnp.maximum(bl + off[:, 3:4] * bl8, 0.0)

            gx0 = kix * sz_x                                 # (tq, P)
            gy0 = kiy * sz_y
            loc_x = ctr_x + cos_t * gx0 - sin_t * gy0
            loc_y = ctr_y + sin_t * gx0 + cos_t * gy0
            gx_pix = loc_x * float(wl) - 0.5                 # grid_sample,
            gy_pix = loc_y * float(hl) - 0.5                 # align_corners=False

            # separable triangle weights == zero-padded bilinear interpolation
            wx = jnp.maximum(0.0, 1.0 - jnp.abs(gx_pix[:, None, :] - ixs[l]))  # (tq,Wl,P)
            wy = jnp.maximum(0.0, 1.0 - jnp.abs(gy_pix[:, None, :] - iys[l]))  # (tq,Hl,P)
            wya = wy * attn[:, None, l * npoint:(l + 1) * npoint]              # (tq,Hl,P)

            amat_l = jnp.einsum("qyp,qxp->qyx", wya, wx,
                                preferred_element_type=jnp.float32)            # (tq,Hl,Wl)
            amat_lvls.append(amat_l.reshape(tq, hl * wl))

        # level-concatenated single value contraction (bf16 MXU operands, f32 acc)
        amat_h = jnp.concatenate(amat_lvls, axis=-1).astype(jnp.bfloat16)      # (tq, Lv)
        v_h = value_ref[0, :, h * head_dim:(h + 1) * head_dim]                 # (Lv, hd) bf16
        att_parts.append(jnp.dot(amat_h, v_h, preferred_element_type=jnp.float32))

    att = jnp.concatenate(att_parts, axis=-1)                # (tq, D) f32, lane-dense

    # fused out_proj + residual + LayerNorm1 (dropout1 = identity); one dense store
    y = (jnp.dot(att.astype(jnp.bfloat16), wo_ref[...],
                 preferred_element_type=jnp.float32) + bo_ref[...])
    x = src_ref[0] + y
    mu = jnp.mean(x, axis=-1, keepdims=True)
    xc = x - mu
    var = jnp.mean(xc * xc, axis=-1, keepdims=True)
    o_ref[0, :, :] = xc * lax.rsqrt(var + eps) * g1_ref[...] + bb1_ref[...]


def box_attention_outproj_ln_pallas(proj, ref_windows, ki, value, src,
                                    w_out, b_out, g1, b1, *,
                                    nhead, head_dim, nlevel, npoint,
                                    level_shapes, n_attn, eps=1e-5, tq_target=128):
    b, lq, dqp = proj.shape
    lv = value.shape[1]
    d = nhead * head_dim
    tq = _pick_tile(lq, tq_target)
    nq = pl.cdiv(lq, tq)

    kern = functools.partial(
        _box_attn_kernel, nhead=nhead, head_dim=head_dim, nlevel=nlevel,
        npoint=npoint, level_shapes=tuple(level_shapes), n_attn=n_attn, eps=eps)

    return pl.pallas_call(
        kern,
        grid=(b, nq),
        in_specs=[
            pl.BlockSpec((1, tq, dqp), lambda i, j: (i, j, 0)),
            pl.BlockSpec((1, tq, 7), lambda i, j: (i, j, 0)),
            pl.BlockSpec((2, npoint), lambda i, j: (0, 0)),
            # value block only changes with batch -> single-buffered, VMEM-resident
            pl.BlockSpec((1, lv, d), lambda i, j: (i, 0, 0),
                         pipeline_mode=pl.Buffered(1)),
            pl.BlockSpec((1, tq, d), lambda i, j: (i, j, 0)),
            pl.BlockSpec((d, d), lambda i, j: (0, 0),
                         pipeline_mode=pl.Buffered(1)),
            pl.BlockSpec((1, d), lambda i, j: (0, 0)),
            pl.BlockSpec((1, d), lambda i, j: (0, 0)),
            pl.BlockSpec((1, d), lambda i, j: (0, 0)),
        ],
        out_specs=pl.BlockSpec((1, tq, d), lambda i, j: (i, j, 0)),
        out_shape=jax.ShapeDtypeStruct((b, lq, d), jnp.float32),
        compiler_params=pltpu.CompilerParams(
            dimension_semantics=("parallel", "parallel"),
            vmem_limit_bytes=64 * 1024 * 1024),               # v7x 64 MiB budget
    )(proj, ref_windows, ki, value, src, w_out, b_out, g1, b1)


# --------------- kernel 3: FFN + residual + LayerNorm2 -----------------------

def _ffn_res_ln_kernel(x_ref, w1_ref, b1_ref, w2_ref, b2_ref, g_ref, bb_ref,
                       o_ref, *, eps):
    x = x_ref[...]
    h = (jnp.dot(x.astype(jnp.bfloat16), w1_ref[...],
                 preferred_element_type=jnp.float32) + b1_ref[...])
    h = jnp.maximum(h, 0.0)                                  # relu (dropout = id)
    y = (jnp.dot(h.astype(jnp.bfloat16), w2_ref[...],
                 preferred_element_type=jnp.float32) + b2_ref[...])
    r = x + y                                                # residual (dropout2 = id)
    mu = jnp.mean(r, axis=-1, keepdims=True)
    rc = r - mu
    var = jnp.mean(rc * rc, axis=-1, keepdims=True)
    o_ref[...] = rc * lax.rsqrt(var + eps) * g_ref[...] + bb_ref[...]


def ffn_add_layernorm_pallas(x2d, w1, b1, w2, b2, gamma, beta, *,
                             eps=1e-5, tm_target=128):
    n, d = x2d.shape
    dff = w1.shape[1]
    tm = _pick_tile(n, tm_target)
    return pl.pallas_call(
        functools.partial(_ffn_res_ln_kernel, eps=eps),
        grid=(pl.cdiv(n, tm),),
        in_specs=[
            pl.BlockSpec((tm, d), lambda i: (i, 0)),
            pl.BlockSpec((d, dff), lambda i: (0, 0),
                         pipeline_mode=pl.Buffered(1)),
            pl.BlockSpec((1, dff), lambda i: (0, 0)),
            pl.BlockSpec((dff, d), lambda i: (0, 0),
                         pipeline_mode=pl.Buffered(1)),
            pl.BlockSpec((1, d), lambda i: (0, 0)),
            pl.BlockSpec((1, d), lambda i: (0, 0)),
            pl.BlockSpec((1, d), lambda i: (0, 0)),
        ],
        out_specs=pl.BlockSpec((tm, d), lambda i: (i, 0)),
        out_shape=jax.ShapeDtypeStruct((n, d), jnp.float32),
        compiler_params=pltpu.CompilerParams(
            dimension_semantics=("parallel",),
            vmem_limit_bytes=64 * 1024 * 1024),
    )(x2d, w1, b1, w2, b2, gamma, beta)


# ------------------------------ glue / module --------------------------------

def make_params(key, d_model, nhead, nlevel, dim_feedforward, npoint):
    """Deterministic synthetic parameters (shapes follow the PyTorch module)."""
    num_variable = 4  # with_rotation=False
    keys = jax.random.split(key, 12)

    def w(k, shape, scale=0.02):
        return scale * jax.random.normal(k, shape, dtype=jnp.float32)

    return {
        "value_proj_w": w(keys[0], (d_model, d_model)),
        "value_proj_b": w(keys[1], (d_model,)),
        "attn_w": w(keys[2], (d_model, nhead * nlevel * npoint)),
        "attn_b": w(keys[3], (nhead * nlevel * npoint,)),
        "box_w": w(keys[4], (d_model, nhead * nlevel * num_variable)),
        "box_b": w(keys[5], (nhead * nlevel * num_variable,)),
        "out_proj_w": w(keys[6], (d_model, d_model)),
        "out_proj_b": w(keys[7], (d_model,)),
        "linear1_w": w(keys[8], (d_model, dim_feedforward)),
        "linear1_b": w(keys[9], (dim_feedforward,)),
        "linear2_w": w(keys[10], (dim_feedforward, d_model)),
        "linear2_b": w(keys[11], (d_model,)),
        "norm1_g": jnp.ones((d_model,), jnp.float32),
        "norm1_b": jnp.zeros((d_model,), jnp.float32),
        "norm2_g": jnp.ones((d_model,), jnp.float32),
        "norm2_b": jnp.zeros((d_model,), jnp.float32),
    }


def box3d_transformer_encoder_layer(params, src, pos, src_shape, src_start_idx,
                                    ref_windows, *, nhead, nlevel, kernel_size):
    del src_start_idx  # level token offsets are derived statically from src_shape
    b, lv, d = src.shape
    assert d % nhead == 0
    head_dim = d // nhead
    npoint = kernel_size * kernel_size
    level_shapes = [(int(h), int(w)) for h, w in np.asarray(src_shape)]
    assert sum(h * w for h, w in level_shapes) == lv
    n = b * lv
    dff = params["linear1_w"].shape[1]

    n_attn = nhead * nlevel * npoint
    n_box = nhead * nlevel * 4
    dqp = ((n_attn + n_box + 127) // 128) * 128              # lane-dense padded width

    src2d = src.reshape(n, d)
    pos2d = pos.reshape(n, d)

    # host-side weight prep: bf16 matmul operands, zero-padded [attn|box] projection
    wv = params["value_proj_w"].astype(jnp.bfloat16)
    bv = params["value_proj_b"].reshape(1, d)
    wqp = jnp.concatenate([params["attn_w"], params["box_w"]], axis=1)
    wqp = jnp.pad(wqp, ((0, 0), (0, dqp - (n_attn + n_box)))).astype(jnp.bfloat16)
    bqp = jnp.pad(jnp.concatenate([params["attn_b"], params["box_b"]], axis=0),
                  (0, dqp - (n_attn + n_box))).reshape(1, dqp)

    # ---- kernel 1: fused pos-embed + value_proj + [attn|box] projection ----
    value2d, proj2d = fused_input_proj_pallas(src2d, pos2d, wv, bv, wqp, bqp)
    proj = proj2d.reshape(b, lv, dqp)                         # free reshapes only —
    value = value2d.reshape(b, lv, d)                         # no transposes, no glue arrays

    ki = make_kernel_indices(kernel_size)                     # (2, P) static table

    # ---- kernel 2: box attention + _where_to_attend glue + out_proj + res + LN1 ----
    src_n1 = box_attention_outproj_ln_pallas(
        proj, ref_windows, ki, value, src,
        params["out_proj_w"].astype(jnp.bfloat16),
        params["out_proj_b"].reshape(1, d),
        params["norm1_g"].reshape(1, d), params["norm1_b"].reshape(1, d),
        nhead=nhead, head_dim=head_dim, nlevel=nlevel, npoint=npoint,
        level_shapes=level_shapes, n_attn=n_attn)              # (B, Lq, D)

    # ---- kernel 3: FFN + residual + norm2 ----
    out = ffn_add_layernorm_pallas(
        src_n1.reshape(n, d),
        params["linear1_w"].astype(jnp.bfloat16), params["linear1_b"].reshape(1, dff),
        params["linear2_w"].astype(jnp.bfloat16), params["linear2_b"].reshape(1, d),
        params["norm2_g"].reshape(1, d), params["norm2_b"].reshape(1, d))
    return out.reshape(b, lv, d)


# ---------------------------------- main --------------------------------------

if __name__ == "__main__":
    key = jax.random.PRNGKey(0)
    d_model, nhead, nlevel, dim_feedforward = 32, 4, 2, 64
    kernel_size = 5                              # Box3dAttention default
    level_shapes = [(8, 8), (4, 4)]
    lv = sum(h * w for h, w in level_shapes)     # 80 tokens
    b = 2

    k_src, k_pos, k_ref, k_par = jax.random.split(key, 4)
    src = jax.random.normal(k_src, (b, lv, d_model), dtype=jnp.float32)
    pos = 0.1 * jax.random.normal(k_pos, (b, lv, d_model), dtype=jnp.float32)

    # ref_windows: (B, Lv, 7) = (cx, cy, cz, w, l, h, theta), normalized [0,1] BEV
    kr = jax.random.split(k_ref, 3)
    centers = jax.random.uniform(kr[0], (b, lv, 3), minval=0.2, maxval=0.8)
    sizes = jax.random.uniform(kr[1], (b, lv, 3), minval=0.05, maxval=0.3)
    thetas = jax.random.uniform(kr[2], (b, lv, 1), minval=-math.pi, maxval=math.pi)
    ref_windows = jnp.concatenate([centers, sizes, thetas], axis=-1).astype(jnp.float32)

    src_shape = np.array(level_shapes, dtype=np.int32)
    src_start_idx = np.array(
        [0, level_shapes[0][0] * level_shapes[0][1]], dtype=np.int32)

    params = make_params(k_par, d_model, nhead, nlevel, dim_feedforward,
                         kernel_size * kernel_size)

    out = box3d_transformer_encoder_layer(
        params, src, pos, src_shape, src_start_idx, ref_windows,
        nhead=nhead, nlevel=nlevel, kernel_size=kernel_size)
    out = jax.block_until_ready(out)

    assert out.shape == (b, lv, d_model)
    assert bool(jnp.all(jnp.isfinite(out)))
    print("KERNEL_OK")
</pallas_src>

<mosaic_0001>
module attributes {stable_mosaic.version = 11 : i64} {
  func.func @_input_proj_kernel(%arg0: i32, %arg1: memref<128x32xf32, #tpu.memory_space<vmem>>, %arg2: memref<128x32xf32, #tpu.memory_space<vmem>>, %arg3: memref<32x32xbf16, #tpu.memory_space<vmem>>, %arg4: memref<1x32xf32, #tpu.memory_space<vmem>>, %arg5: memref<32x256xbf16, #tpu.memory_space<vmem>>, %arg6: memref<1x256xf32, #tpu.memory_space<vmem>>, %arg7: memref<128x32xbf16, #tpu.memory_space<vmem>>, %arg8: memref<128x256xf32, #tpu.memory_space<vmem>>) attributes {dimension_semantics = [#tpu.dimension_semantics<parallel>], iteration_bounds = array<i64: 2>, scalar_prefetch = 0 : i64, scratch_operands = 0 : i64, tpu.core_type = #tpu.core_type<tc>, window_params = [{transform_indices = @transform_0, window_bounds = array<i64: 128, 32>}, {transform_indices = @transform_1, window_bounds = array<i64: 128, 32>}, {pipeline_mode = #tpu.pipeline_mode<synchronous>, transform_indices = @transform_2, window_bounds = array<i64: 32, 32>}, {pipeline_mode = #tpu.pipeline_mode<synchronous>, transform_indices = @transform_3, window_bounds = array<i64: 1, 32>}, {pipeline_mode = #tpu.pipeline_mode<synchronous>, transform_indices = @transform_4, window_bounds = array<i64: 32, 256>}, {pipeline_mode = #tpu.pipeline_mode<synchronous>, transform_indices = @transform_5, window_bounds = array<i64: 1, 256>}, {transform_indices = @transform_6, window_bounds = array<i64: 128, 32>}, {transform_indices = @transform_7, window_bounds = array<i64: 128, 256>}]} {
    %c0 = arith.constant 0 : index
    %c0_0 = arith.constant 0 : index
    %0 = vector.load %arg1[%c0, %c0_0] : memref<128x32xf32, #tpu.memory_space<vmem>>, vector<128x32xf32>
    %c0_1 = arith.constant 0 : index
    %c0_2 = arith.constant 0 : index
    %1 = vector.load %arg2[%c0_1, %c0_2] : memref<128x32xf32, #tpu.memory_space<vmem>>, vector<128x32xf32>
    %2 = arith.addf %0, %1 : vector<128x32xf32>
    %3 = arith.truncf %0 : vector<128x32xf32> to vector<128x32xbf16>
    %4 = arith.truncf %2 : vector<128x32xf32> to vector<128x32xbf16>
    %c0_3 = arith.constant 0 : index
    %c0_4 = arith.constant 0 : index
    %5 = vector.load %arg3[%c0_3, %c0_4] : memref<32x32xbf16, #tpu.memory_space<vmem>>, vector<32x32xbf16>
    %cst = arith.constant dense<0.000000e+00> : vector<128x32xf32>
    %6 = tpu.matmul %3, %5, %cst {dimension_numbers = #tpu.dot_dimension_numbers<[1], [0], [0], [1], [0, 0, 1, 1], [], []>} : vector<128x32xbf16>, vector<32x32xbf16>, vector<128x32xf32> -> vector<128x32xf32>
    %c0_5 = arith.constant 0 : index
    %c0_6 = arith.constant 0 : index
    %7 = vector.load %arg4[%c0_5, %c0_6] : memref<1x32xf32, #tpu.memory_space<vmem>>, vector<1x32xf32>
    %8 = vector.broadcast %7 : vector<1x32xf32> to vector<128x32xf32>
    %9 = arith.addf %6, %8 : vector<128x32xf32>
    %10 = arith.truncf %9 : vector<128x32xf32> to vector<128x32xbf16>
    %c0_7 = arith.constant 0 : index
    %c0_8 = arith.constant 0 : index
    %11 = vector.load %arg7[%c0_7, %c0_8] : memref<128x32xbf16, #tpu.memory_space<vmem>>, vector<128x32xbf16>
    tpu.vector_store %arg7[%c0_7, %c0_8], %10 {strides = array<i32>} : memref<128x32xbf16, #tpu.memory_space<vmem>>, vector<128x32xbf16>,
    %c0_9 = arith.constant 0 : index
    %c0_10 = arith.constant 0 : index
    %12 = vector.load %arg5[%c0_9, %c0_10] : memref<32x256xbf16, #tpu.memory_space<vmem>>, vector<32x256xbf16>
    %cst_11 = arith.constant dense<0.000000e+00> : vector<128x256xf32>
    %13 = tpu.matmul %4, %12, %cst_11 {dimension_numbers = #tpu.dot_dimension_numbers<[1], [0], [0], [1], [0, 0, 1, 1], [], []>} : vector<128x32xbf16>, vector<32x256xbf16>, vector<128x256xf32> -> vector<128x256xf32>
    %c0_12 = arith.constant 0 : index
    %c0_13 = arith.constant 0 : index
    %14 = vector.load %arg6[%c0_12, %c0_13] : memref<1x256xf32, #tpu.memory_space<vmem>>, vector<1x256xf32>
    %15 = vector.broadcast %14 : vector<1x256xf32> to vector<128x256xf32>
    %16 = arith.addf %13, %15 : vector<128x256xf32>
    %c0_14 = arith.constant 0 : index
    %c0_15 = arith.constant 0 : index
    %17 = vector.load %arg8[%c0_14, %c0_15] : memref<128x256xf32, #tpu.memory_space<vmem>>, vector<128x256xf32>
    tpu.vector_store %arg8[%c0_14, %c0_15], %16 {strides = array<i32>} : memref<128x256xf32, #tpu.memory_space<vmem>>, vector<128x256xf32>,
    return
  }
  func.func @transform_0(%arg0: i32) -> (i32, i32) {
    %c0_i32 = arith.constant 0 : i32
    %c0_i32_0 = arith.constant 0 : i32
    return %arg0, %c0_i32 : i32, i32
  }
  func.func @transform_1(%arg0: i32) -> (i32, i32) {
    %c0_i32 = arith.constant 0 : i32
    %c0_i32_0 = arith.constant 0 : i32
    return %arg0, %c0_i32 : i32, i32
  }
  func.func @transform_2(%arg0: i32) -> (i32, i32) {
    %c0_i32 = arith.constant 0 : i32
    %c0_i32_0 = arith.constant 0 : i32
    %c0_i32_1 = arith.constant 0 : i32
    return %c0_i32, %c0_i32_0 : i32, i32
  }
  func.func @transform_3(%arg0: i32) -> (i32, i32) {
    %c0_i32 = arith.constant 0 : i32
    %c0_i32_0 = arith.constant 0 : i32
    %c0_i32_1 = arith.constant 0 : i32
    return %c0_i32, %c0_i32_0 : i32, i32
  }
  func.func @transform_4(%arg0: i32) -> (i32, i32) {
    %c0_i32 = arith.constant 0 : i32
    %c0_i32_0 = arith.constant 0 : i32
    %c0_i32_1 = arith.constant 0 : i32
    return %c0_i32, %c0_i32_0 : i32, i32
  }
  func.func @transform_5(%arg0: i32) -> (i32, i32) {
    %c0_i32 = arith.constant 0 : i32
    %c0_i32_0 = arith.constant 0 : i32
    %c0_i32_1 = arith.constant 0 : i32
    return %c0_i32, %c0_i32_0 : i32, i32
  }
  func.func @transform_6(%arg0: i32) -> (i32, i32) {
    %c0_i32 = arith.constant 0 : i32
    %c0_i32_0 = arith.constant 0 : i32
    return %arg0, %c0_i32 : i32, i32
  }
  func.func @transform_7(%arg0: i32) -> (i32, i32) {
    %c0_i32 = arith.constant 0 : i32
    %c0_i32_0 = arith.constant 0 : i32
    return %arg0, %c0_i32 : i32, i32
  }
}

</mosaic_0001>

<bundles_post_ra>
// kernel: tpu_custom_call.1
= control target key start
LH: loop header
LB: loop body
LE: loop exit
PB: predicated region body
PF: predicated region fallthrough
CT: control target
= control target key end

     0   :  { %s2325_s0 = inlined_call_operand.hbm [shape: f32[160,32], index: 0, kind: input, shape index: {}]   ;;  %s2326_s1 = inlined_call_operand.hbm [shape: f32[160,32], index: 1, kind: input, shape index: {}]   ;;  %s2327_s2 = inlined_call_operand.hbm [shape: bf16[32,32], index: 2, kind: input, shape index: {}]   ;;  %s2328_s3 = inlined_call_operand.hbm [shape: f32[1,32], index: 3, kind: input, shape index: {}]   ;;  %s2329_s4 = inlined_call_operand.hbm [shape: bf16[32,256], index: 4, kind: input, shape index: {}]   ;;  %s2330_s5 = inlined_call_operand.hbm [shape: f32[1,256], index: 5, kind: input, shape index: {}]   ;;  %s2331_s6 = inlined_call_operand.hbm [shape: bf16[160,32], index: 6, kind: output, shape index: {0}]   ;;  %s2332_s7 = inlined_call_operand.hbm [shape: f32[160,256], index: 7, kind: output, shape index: {1}]  }
   0x1   :  { %2340 = sst [smem:[#allocation27_spill]] %s2328_s3 }
   0x2   :  { %13 = vsyncpa [#allocation3], 0 }
   0x3   :  { %15 = vsyncpa [#allocation3 + $0x1], 0 }
   0x4   :  { %16 = vsyncpa [#allocation6], 0 }
   0x5   :  { %18 = vsyncpa [#allocation6 + $0x1], 0 }
   0x6   :  { %19 = vsyncpa [#allocation9], 0 }
   0x7   :  { %20 = vsyncpa [#allocation12], 0 }
   0x8   :  { %21 = vsyncpa [#allocation4], 0 }
   0x9   :  { %23 = vsyncpa [#allocation4 + $0x1], 0 }
   0xa   :  { %24 = vsyncpa [#allocation15], 0 }
   0xb   :  { %26 = vsyncpa [#allocation15 + $0x1], 0  ;;  %s1740_s24 = smov 0   ;;  %s1742_s25 = smov 0  }
   0xc   :  { %s1744_s26 = smov 0   ;;  %s1746_s27 = smov 0  }
   0xd LB: > { %2341 = sst [smem:[#allocation23_spill]] %s1665_s24  ;;  %s1761_s28 = sadd.s32 4294967295, %s1677_s27   ;;  %s1677_s27 = sphi %s1746_s27, %s2368_s27   ;;  %s1673_s26 = sphi %s1744_s26, %s2372_s26   ;;  %s1669_s25 = sphi %s1742_s25, %s2371_s25   ;;  %s1665_s24 = sphi %s1740_s24, %s2370_s24  }
   0xe   : > { %s1146_s29 = sadd.s32 4294967294, %s1677_s27   ;;  %s1765_s30 = sadd.s32 1, %s1677_s27  }
   0xf   : > { %2342 = sst [smem:[#allocation24_spill]] %s1765_s30  ;;  %s39_s8 = sadd.s32 1, %s1673_s26 }
  0x10   : > { %s36_s9 = ssub.s32 %s1677_s27, %s1765_s30  ;;  %p46_p0 = scmp.ne.s32.totalorder %s1673_s26, %s1669_s25 }
  0x11   : > { %p37_p1 = scmp.eq.s32.totalorder %s36_s9, 0  ;;  %p47_p2 = scmp.eq.s32.totalorder %s1677_s27, 0 }
  0x12   : > { %p52_p3 = scmp.ne.s32.totalorder %s1669_s25, %s1665_s24  ;;  %p2333_p4 = scmp.eq.s32.totalorder %s1761_s28, 0 }
  0x13   : > { %s1777_s10 = scalar_select %p37_p1, %s1673_s26, %s39_s8  }
  0x14   : > { %p1779_p5 = por %p47_p2, %p46_p0  ;;  %p1785_p6 = por %p2333_p4, %p52_p3 }
  0x15   : > { %2343 = sst [smem:[#allocation25_spill]] %s1777_s10  ;;  %p186_p7 = scmp.eq.s32.totalorder %s1761_s28, 1 }
  0x16   : > { %s2344_s11 = scalar_select %p1779_p5, 1, 0 }
  0x17   : > { %s2345_s12 = scalar_select %p1785_p6, 1, 0 }
  0x18   : > { %p192_p8 = scmp.eq.s32.totalorder %s1146_s29, 1  ;;  %p1147_p9 = scmp.ge.s32.totalorder %s1677_s27, 1 }
  0x19   : > { %p225_p10 = scmp.lt.s32.totalorder %s1677_s27, 3  ;;  %p1792_p11 = por %p186_p7, %p46_p0 }
  0x1a   : > { %p1796_p12 = por %p192_p8, %p52_p3  ;;  %s1679_s16 = smov [#allocation8]  }
  0x1b   : > { %s2346_s13 = scalar_select %p1792_p11, 1, 0 }
  0x1c   : > { %s2347_s14 = scalar_select %p1796_p12, 1, 0 }
  0x1d   : > { %p1800_p13 = pnand %p1147_p9, %p225_p10  ;;  %s251_s17 = sshll.u32 %s1679_s16, 4  ;;  %s252_s17 = int_to_ptr.vmem [resolvable:$true] %s251_s17 }
  0x1e   : > { %2348 = sst [smem:[#allocation26_spill]] %s2347_s14  ;;  %s1680_s18 = smov [#allocation7]  }
  0x1f   : > { %s2349_s15 = scalar_select %p1800_p13, 1, 0 }
  0x20   : > { %p1309_p1 = pneg %p1800_p13  ;;  %s237_s19 = sshll.u32 %s1680_s18, 4  ;;  %s1812_s19 = int_to_ptr.vmem [resolvable:$true] %s237_s19 }
  0x21   : > { %s2351_s3 = sld [smem:[#allocation27_spill]] }
  0x22   : > { %p1808_p0 = pnand %p1309_p1, %p2333_p4 }
  0x24   : > { %p1822_p3 = pneg %p1808_p0 }
  0x27   : > { %s1395_s23 = scalar_lea.hbm %s2351_s3, 16 }
  0x28   : > { %p1396_p2 = scmp.ne.s32.totalorder %s2351_s3, %s1395_s23  ;;  %p1402_p9 = scmp.lt.u32.totalorder %s1395_s23, %s2351_s3 }
  0x2a   : > { %p1398_p7 = pnand %p1822_p3, %p1396_p2 }
  0x2c   : > { %p1399_p8 = pneg %p1398_p7 }
  0x2e   : > { %p1404_p10 = pnand %p1402_p9, %p1399_p8 }
  0x30   : > { %1407 = shalt.err (!%p1404_p10)
}
  0x31   : > { %s1408_s21 = scalar_lea.vmem %s252_s17, 16  ;;  %s1415_s22 = scalar_lea.vmem %s252_s17, 32 }
  0x32   : > { %p1409_p1 = scmp.ne.s32.totalorder %s252_s17, %s1408_s21  ;;  %p1416_p11 = scmp.lt.s32.totalorder %s252_s17, %s252_s17 }
  0x33   : > { %p1417_p6 = scmp.lt.s32.totalorder %s1415_s22, %s1408_s21 }
  0x34   : > { %p1411_p4 = pnand %p1409_p1, %p1822_p3 }
  0x35   : > { %p1418_p13 = por %p1417_p6, %p1416_p11 }
  0x36   : > { %p1412_p12 = pneg %p1411_p4 }
  0x38   : > { %p1419_p5 = pnand %p1418_p13, %p1412_p12 }
  0x3a   : > { %1422 = shalt.err (!%p1419_p5)
}
  0x3b   : > { %1315 = dma.hbm_to_vmem [thread:$0]  (!%p1808_p0), %s2351_s3, 16, %s252_s17, [#allocation9]  }
  0x3c   : > { %s1423_s18 = scalar_lea.hbm %s2327_s2, 256 }
  0x3d   : > { %p1424_p4 = scmp.ne.s32.totalorder %s2327_s2, %s1423_s18  ;;  %p1430_p5 = scmp.lt.u32.totalorder %s1423_s18, %s2327_s2 }
  0x3f   : > { %p1426_p2 = pnand %p1424_p4, %p1822_p3 }
  0x41   : > { %p1427_p6 = pneg %p1426_p2 }
  0x43   : > { %p1432_p11 = pnand %p1430_p5, %p1427_p6 }
  0x45   : > { %1435 = shalt.err (!%p1432_p11)
}
  0x46   : > { %s1436_s17 = scalar_lea.vmem %s1812_s19, 256  ;;  %p1444_p8 = scmp.lt.s32.totalorder %s1812_s19, %s1812_s19 }
  0x47   : > { %p1437_p12 = scmp.ne.s32.totalorder %s1812_s19, %s1436_s17  ;;  %p1445_p9 = scmp.lt.s32.totalorder %s1436_s17, %s1436_s17 }
  0x49   : > { %p1439_p13 = pnand %p1437_p12, %p1822_p3  ;;  %p1446_p10 = por %p1445_p9, %p1444_p8 }
  0x4b   : > { %p1440_p7 = pneg %p1439_p13 }
  0x4d   : > { %p1447_p1 = pnand %p1446_p10, %p1440_p7 }
  0x4f   : > { %1450 = shalt.err (!%p1447_p1)
}
  0x50   : > { %s1681_s30 = smov 64   ;;  %s1682_s10 = smov 4  }
  0x51   : > { %1312 = dma.hbm_to_vmem [thread:$0]  (!%p1808_p0), %s2327_s2, 256, %s1812_s19, [#allocation6], %s1681_s30, %s1681_s30, %s1682_s10  }
  0x52   : > { %s1683_s23 = smov [#allocation10]   ;;  %s1451_s22 = scalar_lea.hbm %s2329_s4, 512 }
  0x53   : > { %s261_s16 = sshll.u32 %s1683_s23, 4  ;;  %p1452_p4 = scmp.ne.s32.totalorder %s2329_s4, %s1451_s22  ;;  %s262_s16 = int_to_ptr.vmem [resolvable:$true] %s261_s16 }
  0x54   : > { %p1458_p5 = scmp.lt.u32.totalorder %s1451_s22, %s2329_s4 }
  0x55   : > { %p1454_p2 = pnand %p1452_p4, %p1822_p3 }
  0x57   : > { %p1455_p6 = pneg %p1454_p2 }
  0x59   : > { %p1460_p11 = pnand %p1458_p5, %p1455_p6 }
  0x5b   : > { %1463 = shalt.err (!%p1460_p11)
}
  0x5c   : > { %s1464_s19 = scalar_lea.vmem %s262_s16, 512  ;;  %p1472_p8 = scmp.lt.s32.totalorder %s262_s16, %s262_s16 }
  0x5d   : > { %p1465_p12 = scmp.ne.s32.totalorder %s262_s16, %s1464_s19  ;;  %p1473_p9 = scmp.lt.s32.totalorder %s1464_s19, %s1464_s19 }
  0x5f   : > { %p1467_p13 = pnand %p1465_p12, %p1822_p3  ;;  %p1474_p10 = por %p1473_p9, %p1472_p8 }
  0x61   : > { %p1468_p7 = pneg %p1467_p13 }
  0x63   : > { %p1475_p1 = pnand %p1474_p10, %p1468_p7 }
  0x65   : > { %1478 = shalt.err (!%p1475_p1)
}
  0x66   : > { %s1684_s3 = smov 128   ;;  %s1685_s30 = smov 8  }
  0x67   : > { %1318 = dma.hbm_to_vmem [thread:$0]  (!%p1808_p0), %s2329_s4, 512, %s262_s16, [#allocation9], %s1684_s3, %s1684_s3, %s1685_s30  }
  0x68   : > { %s1686_s10 = smov [#allocation11]   ;;  %s1479_s18 = scalar_lea.hbm %s2330_s5, 32 }
  0x69   : > { %s275_s29 = sshll.u32 %s1686_s10, 4  ;;  %p1480_p4 = scmp.ne.s32.totalorder %s2330_s5, %s1479_s18  ;;  %s276_s29 = int_to_ptr.vmem [resolvable:$true] %s275_s29 }
  0x6a   : > { %p1486_p5 = scmp.lt.u32.totalorder %s1479_s18, %s2330_s5 }
  0x6b   : > { %p1482_p2 = pnand %p1480_p4, %p1822_p3 }
  0x6d   : > { %p1483_p6 = pneg %p1482_p2 }
  0x6f   : > { %p1488_p11 = pnand %p1486_p5, %p1483_p6 }
  0x71   : > { %1491 = shalt.err (!%p1488_p11)
}
  0x72   : > { %s1492_s16 = scalar_lea.vmem %s276_s29, 32  ;;  %p1500_p8 = scmp.lt.s32.totalorder %s276_s29, %s276_s29 }
  0x73   : > { %p1493_p12 = scmp.ne.s32.totalorder %s276_s29, %s1492_s16  ;;  %p1501_p9 = scmp.lt.s32.totalorder %s1492_s16, %s1492_s16 }
  0x75   : > { %p1495_p13 = pnand %p1493_p12, %p1822_p3  ;;  %p1502_p10 = por %p1501_p9, %p1500_p8 }
  0x77   : > { %p1496_p7 = pneg %p1495_p13 }
  0x79   : > { %p1503_p1 = pnand %p1502_p10, %p1496_p7 }
  0x7b   : > { %1506 = shalt.err (!%p1503_p1)
}
  0x7c   : > { %1321 = dma.hbm_to_vmem [thread:$0]  (!%p1808_p0), %s2330_s5, 32, %s276_s29, [#allocation12]  }
  0x7d   : > { %p1152_p4 = scmp.ge.s32.totalorder %s1677_s27, 2 }
  0x7e   : > { %p2353_p2 = scmp.ne.s32.totalorder (!%p1152_p4), %s2344_s11, 0 }
  0x7f   : > { %282 = sbr.rel (%p1152_p4) target bundleno = 206 (0xce), region = 32 }
  0x86   : > { %285 = sbr.rel (!%p2353_p2) target bundleno = 169 (0xa9), region = 36  ;;  %s286_s9 = sand.u32 (%p2353_p2), 1, %s1673_s26  }
  0x87   : > { %s1154_s24 = sshll.u32 (%p2353_p2), %s1677_s27, 4  ;;  %s1153_s14 = sshll.u32 (%p2353_p2), %s286_s9, 7 }
  0x88   : > { %s292_s10 = ssub.s32 (%p2353_p2), 20, %s1154_s24  ;;  %s1907_s8 = scalar_lea.sflag (%p2353_p2), [#allocation3], %s286_s9 }
  0x89   : > { %p293_p3 = scmp.lt.s32.totalorder (%p2353_p2), %s292_s10, 16  ;;  %s290_s23 = scalar_lea.vmem (%p2353_p2), [#allocation2], %s1153_s14 }
  0x8d   : > { %s2374_s10 = smov (!%p293_p3, %s292_s10), 16 }
  0x8e   : > { %s1904_s20 = sshll.u32 %s2374_s10, 7 }
  0x8f   : > { %s297_s29 = ssub.s32 2048, %s1904_s20 }
  0x90   : > { %298 = vsyncadd %s1907_s8, %s297_s29  ;;  %p1156_p0 = scmp.ne.s32.totalorder %s1904_s20, 0  ;;  %s1233_s18 = sshll.u32 %s1677_s27, 11 }
  0x91   : > { %s1915_s17 = scalar_lea.hbm %s2325_s0, %s1233_s18  ;;  %s303_s19 = sshll.u32 %s290_s23, 4  ;;  %s1917_s19 = int_to_ptr.vmem [resolvable:$true] %s303_s19 }
  0x92   : > { %s1507_s16 = scalar_lea.hbm %s1915_s17, %s1904_s20  ;;  %s1511_s9 = scalar_lea.hbm %s2325_s0, 2560 }
  0x93   : > { %p1508_p6 = scmp.ne.s32.totalorder %s1915_s17, %s1507_s16  ;;  %p1512_p12 = scmp.lt.u32.totalorder %s1915_s17, %s2325_s0 }
  0x94   : > { %p1513_p13 = scmp.lt.u32.totalorder %s1511_s9, %s1507_s16  ;;  %p1515_p8 = scmp.lt.u32.totalorder %s1507_s16, %s1915_s17 }
  0x95   : > { %p1509_p5 = pnand %p1508_p6, %p1156_p0 }
  0x96   : > { %p1514_p7 = por %p1513_p13, %p1512_p12 }
  0x97   : > { %p1510_p11 = pneg %p1509_p5 }
  0x98   : > { %p1516_p9 = por %p1515_p8, %p1514_p7 }
  0x9a   : > { %p1517_p10 = pnand %p1516_p9, %p1510_p11 }
  0x9c   : > { %1520 = shalt.err (!%p1517_p10)
}
  0x9d   : > { %s1521_s10 = scalar_lea.vmem %s1917_s19, %s1904_s20  ;;  %s1687_s29 = smov [#allocation2]  }
  0x9e   : > { %p1522_p1 = scmp.ne.s32.totalorder %s1917_s19, %s1521_s10  ;;  %s1525_s23 = sshll.u32 %s1687_s29, 4  ;;  %s1526_s23 = int_to_ptr.vmem [resolvable:$false] %s1525_s23 }
  0x9f   : > { %s1527_s18 = scalar_lea.vmem %s1526_s23, 4096  ;;  %p1528_p6 = scmp.lt.s32.totalorder %s1917_s19, %s1526_s23 }
  0xa0   : > { %p1523_p2 = pnand %p1522_p1, %p1156_p0  ;;  %p1529_p5 = scmp.lt.s32.totalorder %s1527_s18, %s1521_s10 }
  0xa2   : > { %p1524_p3 = pneg %p1523_p2  ;;  %p1530_p12 = por %p1529_p5, %p1528_p6 }
  0xa4   : > { %p1531_p13 = pnand %p1530_p12, %p1524_p3 }
  0xa6   : > { %1534 = shalt.err (!%p1531_p13)
}
  0xa7   : > { %s1688_s21 = smov 128   ;;  %s1689_s22 = smov 8  }
  0xa8   : > { %309 = dma.hbm_to_vmem [thread:$0]  (%p1156_p0), %s1915_s17, %s1904_s20, %s1917_s19, %s1907_s8, %s1688_s21, %s1688_s21, %s1689_s22  }
  0xa9 PF: > { %p2354_p11 = scmp.ne.s32.totalorder %s2344_s11, 0 }
  0xaa   : > { %s313_s16 = sand.u32 (%p2354_p11), 1, %s1677_s27   ;;  %s315_s3 = sand.u32 (%p2354_p11), 1, %s1673_s26  }
  0xab   : > { %312 = sbr.rel (!%p2354_p11) target bundleno = 206 (0xce), region = 40  ;;  %s1160_s30 = sshll.u32 (%p2354_p11), %s315_s3, 7 }
  0xac   : > { %s1161_s9 = sshll.u32 (%p2354_p11), %s1677_s27, 4  ;;  %s1952_s29 = scalar_lea.sflag (%p2354_p11), [#allocation6], %s313_s16 }
  0xad   : > { %s319_s24 = ssub.s32 (%p2354_p11), 20, %s1161_s9  ;;  %s317_s20 = scalar_lea.vmem (%p2354_p11), [#allocation5], %s1160_s30 }
  0xae   : > { %p320_p7 = scmp.lt.s32.totalorder (%p2354_p11), %s319_s24, 16 }
  0xb2   : > { %s2376_s24 = smov (!%p320_p7, %s319_s24), 16 }
  0xb3   : > { %s1949_s14 = sshll.u32 %s2376_s24, 7 }
  0xb4   : > { %s324_s10 = ssub.s32 2048, %s1949_s14 }
  0xb5   : > { %325 = vsyncadd %s1952_s29, %s324_s10  ;;  %p1163_p0 = scmp.ne.s32.totalorder %s1949_s14, 0  ;;  %s1234_s11 = sshll.u32 %s1677_s27, 11 }
  0xb6   : > { %s1960_s19 = scalar_lea.hbm %s2326_s1, %s1234_s11  ;;  %s330_s23 = sshll.u32 %s317_s20, 4  ;;  %s1962_s23 = int_to_ptr.vmem [resolvable:$true] %s330_s23 }
  0xb7   : > { %s1535_s18 = scalar_lea.hbm %s1960_s19, %s1949_s14  ;;  %s1539_s16 = scalar_lea.hbm %s2326_s1, 2560 }
  0xb8   : > { %p1536_p8 = scmp.ne.s32.totalorder %s1960_s19, %s1535_s18  ;;  %p1540_p1 = scmp.lt.u32.totalorder %s1960_s19, %s2326_s1 }
  0xb9   : > { %p1541_p2 = scmp.lt.u32.totalorder %s1539_s16, %s1535_s18  ;;  %p1543_p6 = scmp.lt.u32.totalorder %s1535_s18, %s1960_s19 }
  0xba   : > { %p1537_p9 = pnand %p1536_p8, %p1163_p0 }
  0xbb   : > { %p1542_p3 = por %p1541_p2, %p1540_p1 }
  0xbc   : > { %p1538_p10 = pneg %p1537_p9 }
  0xbd   : > { %p1544_p5 = por %p1543_p6, %p1542_p3 }
  0xbf   : > { %p1545_p12 = pnand %p1544_p5, %p1538_p10 }
  0xc1   : > { %1548 = shalt.err (!%p1545_p12)
}
  0xc2   : > { %s1549_s9 = scalar_lea.vmem %s1962_s23, %s1949_s14  ;;  %s1690_s24 = smov [#allocation5]  }
  0xc3   : > { %p1550_p13 = scmp.ne.s32.totalorder %s1962_s23, %s1549_s9  ;;  %s1553_s10 = sshll.u32 %s1690_s24, 4  ;;  %s1554_s10 = int_to_ptr.vmem [resolvable:$false] %s1553_s10 }
  0xc4   : > { %s1555_s20 = scalar_lea.vmem %s1554_s10, 4096  ;;  %p1556_p8 = scmp.lt.s32.totalorder %s1962_s23, %s1554_s10 }
  0xc5   : > { %p1551_p11 = pnand %p1550_p13, %p1163_p0  ;;  %p1557_p9 = scmp.lt.s32.totalorder %s1555_s20, %s1549_s9 }
  0xc7   : > { %p1552_p7 = pneg %p1551_p11  ;;  %p1558_p1 = por %p1557_p9, %p1556_p8 }
  0xc9   : > { %p1559_p2 = pnand %p1558_p1, %p1552_p7 }
  0xcb   : > { %1562 = shalt.err (!%p1559_p2)
}
  0xcc   : > { %s1691_s11 = smov 128   ;;  %s1692_s8 = smov 8  }
  0xcd   : > { %336 = dma.hbm_to_vmem [thread:$0]  (%p1163_p0), %s1960_s19, %s1949_s14, %s1962_s23, %s1952_s29, %s1691_s11, %s1691_s11, %s1692_s8  }
  0xce PF: > { %p2355_p10 = scmp.ne.s32.totalorder %s2349_s15, 0 }
  0xcf   : > { %s1992_s17 = sand.u32 (!%p2355_p10), 1, %s1669_s25   ;;  %p2356_p3 = scmp.ne.s32.totalorder (!%p2355_p10), %s2345_s12, 0 }
  0xd0   : > { %342 = sbr.rel (%p2355_p10) target bundleno = 562 (0x232), region = 44  ;;  %s1168_s18 = sshll.u32 (!%p2355_p10), %s1992_s17, 7 }
  0xd1   : > { %s345_s21 = scalar_lea.sflag (!%p2355_p10), [#allocation3], %s1992_s17  ;;  %s1996_s22 = scalar_lea.vmem (!%p2355_p10), [#allocation2], %s1168_s18 }
  0xd7   : > { %1636 = dma.done.wait (%p2356_p3), %s345_s21, 2048  }
  0xd8   : > { %1638 = vsyncadd (%p2356_p3), %s345_s21, 4294965248  ;;  %s353_s14 = sand.u32 1, %s1761_s28   ;;  %s2003_s29 = scalar_lea.vmem [#allocation5], %s1168_s18 }
  0xd9   : > { %s354_s15 = scalar_lea.sflag [#allocation6], %s353_s14 }
  0xda   : > { %1640 = dma.done.wait (%p2356_p3), %s354_s15, 2048  }
  0xdb   : > { %1642 = vsyncadd (%p2356_p3), %s354_s15, 4294965248  ;;  %p2357_p0 = scmp.eq.s32.totalorder %s1761_s28, 0 }
  0xdd   : > { %1644 = dma.done.wait (%p2357_p0), [#allocation6], 256   ;;  %p2358_p6 = pmov %p2357_p0 }
  0xde   : > { %p2359_p5 = pmov %p2357_p0 }
  0xdf   : > { %1646 = vsyncadd (%p2358_p6), [#allocation6], 4294967040 }
  0xe0   : > { %1648 = dma.done.wait (%p2359_p5), [#allocation9], 528   ;;  %p2360_p12 = pmov %p2357_p0 }
  0xe1   : > { %p2361_p13 = pmov %p2357_p0 }
  0xe2   : > { %1650 = vsyncadd (%p2360_p12), [#allocation9], 4294966768 }
  0xe3   : > { %1652 = dma.done.wait (%p2361_p13), [#allocation12], 32   ;;  %p2362_p11 = pmov %p2357_p0 }
  0xe4   : > { %v1693_v0 = vmov 0   ;;  %v1387_v1 = vld [vmem:[#allocation7] sm:$0xff]   ;;  %v1390_v3 = vld [vmem:[#allocation10] ss:$8 sps:$4 sm:$0xff]   ;;  %v1391_v4 = vld [vmem:[#allocation7 + $0x8] sm:$0xff]   ;;  %vm523_vm0 = vcmask 261120  }
  0xe5   : > { %1654 = vsyncadd (%p2362_p11), [#allocation12], 4294967264  ;;  %838 = vmatprep.mubr.bf16.mxu1 %v1693_v0  ;;  %v1388_v2 = vld [vmem:[#allocation10 + $0x4] ss:$8 sps:$4 sm:$0xff]   ;;  %1265 = vmatprep.subr.bf16.mxu0 %v1387_v1  ;;  %v1392_v5 = vld [vmem:[#allocation10 + $0x14] ss:$8 sps:$4 sm:$0xff]  }
  0xe6   : > { %1285 = vmatprep.subr.bf16.mxu1 %v1388_v2  ;;  %1266 = vmatpush3.bf16.msra.mxu0 %v1387_v1  ;;  %v1394_v6 = vld [vmem:[#allocation10 + $0x10] ss:$8 sps:$4 sm:$0xff]   ;;  %v2031_v10 = vld [vmem:[%s1996_s22 + $0x10] sm:$0xff]  ;;  %v2034_v11 = vld [vmem:[%s1996_s22 + $0x18] sm:$0xff]  ;;  %s1174_s12 = sshll.u32 %s1992_s17, 6  ;;  %s1175_s19 = sshll.u32 %s1992_s17, 8 }
  0xe7   : > { %1287 = vmatpush1.bf16.msra.mxu1 %v1390_v3  ;;  %v2023_v7 = vld [vmem:[%s1996_s22] sm:$0xff]  ;;  %1267 = vmatprep.subr.bf16.mxu0 %v1391_v4  ;;  %v2026_v8 = vld [vmem:[%s1996_s22 + $0x8] sm:$0xff]  ;;  %v485_v13 = vpack.c.bf16 %v2034_v11, %v2031_v10  ;;  %v442_v19 = vld [vmem:[%s1996_s22 + $0x30] sm:$0xff]  ;;  %vm709_vm1 = vcmask 257024   ;;  %s2107_s23 = scalar_lea.vmem [#allocation13], %s1174_s12  ;;  %s2111_s16 = scalar_lea.vmem [#allocation14], %s1175_s19 }
  0xe8   : > { %1286 = vmatprep.subr.bf16.mxu1 %v1392_v5  ;;  %v484_v9 = vpack.c.bf16 %v2026_v8, %v2023_v7  ;;  %v440_v12 = vld [vmem:[%s1996_s22 + $0x20] sm:$0xff]  ;;  %v441_v14 = vld [vmem:[%s1996_s22 + $0x28] sm:$0xff]  ;;  %v443_v21 = vld [vmem:[%s1996_s22 + $0x38] sm:$0xff]  ;;  %s932_s3 = scalar_lea.sflag [#allocation4], %s1992_s17  ;;  %s937_s30 = scalar_lea.sflag [#allocation15], %s1992_s17 }
  0xe9   : > { %v456_v15 = vld [vmem:[%s2003_s29 + $0x20] sm:$0xff]  ;;  %v457_v16 = vld [vmem:[%s2003_s29 + $0x28] sm:$0xff]  ;;  %v486_v20 = vpack.c.bf16 %v441_v14, %v440_v12  ;;  %v458_v22 = vld [vmem:[%s2003_s29 + $0x30] sm:$0xff]  ;;  %v487_v29 = vpack.c.bf16 %v443_v21, %v442_v19  ;;  %p2363_p7 = scmp.ne.s32.totalorder %s2346_s13, 0 }
  0xea   : > { %1268 = vmatpush3.bf16.msra.mxu0 %v1391_v4  ;;  %1269 = vmatprep.mubr.msk.bf16.mxu0 %vm523_vm0, %v484_v9  ;;  %v472_v17 = vadd.f32 %v456_v15, %v440_v12  ;;  %v473_v18 = vadd.f32 %v457_v16, %v441_v14  ;;  %v459_v23 = vld [vmem:[%s2003_s29 + $0x38] sm:$0xff]  ;;  %v474_v25 = vadd.f32 %v458_v22, %v442_v19  ;;  %v444_v27 = vld [vmem:[%s1996_s22 + $0x40] sm:$0xff]  ;;  %v445_v28 = vld [vmem:[%s1996_s22 + $0x48] sm:$0xff]  ;;  %s1217_s9 = sshll.u32 (%p2363_p7), %s1761_s28, 4 }
  0xeb   : > { %1288 = vmatpush1.bf16.msra.mxu1 %v1394_v6  ;;  %786 = vmatprep.subr.bf16.mxu0 %v1388_v2  ;;  %v475_v26 = vadd.f32 %v459_v23, %v443_v21  ;;  %v488_v30 = vpack.c.bf16 %v445_v28, %v444_v27  ;;  %v460_v32 = vld [vmem:[%s2003_s29 + $0x40] sm:$0xff]  ;;  %v461_v33 = vld [vmem:[%s2003_s29 + $0x48] sm:$0xff]  ;;  %v446_v34 = vld [vmem:[%s1996_s22 + $0x50] sm:$0xff]  ;;  %s945_s24 = ssub.s32 (%p2363_p7), 20, %s1217_s9 }
  0xec   : > { %v494_v24 = vpack.c.bf16 %v473_v18, %v472_v17  ;;  %v447_v35 = vld [vmem:[%s1996_s22 + $0x58] sm:$0xff]  ;;  %v476_v36 = vadd.f32 %v460_v32, %v444_v27  ;;  %v477_v37 = vadd.f32 %v461_v33, %v445_v28  ;;  %v448_v38 = vld [vmem:[%s1996_s22 + $0x60] sm:$0xff]  ;;  %v449_v39 = vld [vmem:[%s1996_s22 + $0x68] sm:$0xff]  ;;  %p946_p8 = scmp.lt.s32.totalorder (%p2363_p7), %s945_s24, 16 }
  0xed   : > { %1270 = vmatmul.mubr.msk.bf16.vlgmr.msra.gmra.mrb[0].mxu0 %vm523_vm0, %v485_v13  ;;  %v495_v31 = vpack.c.bf16 %v475_v26, %v474_v25  ;;  %v489_v40 = vpack.c.bf16 %v447_v35, %v446_v34  ;;  %v490_v41 = vpack.c.bf16 %v449_v39, %v448_v38  ;;  %v462_v43 = vld [vmem:[%s2003_s29 + $0x50] sm:$0xff]  ;;  %v463_v44 = vld [vmem:[%s2003_s29 + $0x58] sm:$0xff]  ;;  %v452_v50 = vld [vmem:[%s2003_s29] sm:$0xff] }
  0xee   : > { %787 = vmatpush1.bf16.msra.mxu0 %v1390_v3  ;;  %1273 = vmatprep.mubr.msk.bf16.mxu0 %vm523_vm0, %v486_v20  ;;  %v496_v42 = vpack.c.bf16 %v477_v37, %v476_v36  ;;  %v450_v45 = vld [vmem:[%s1996_s22 + $0x70] sm:$0xff]  ;;  %v451_v46 = vld [vmem:[%s1996_s22 + $0x78] sm:$0xff]  ;;  %v478_v47 = vadd.f32 %v462_v43, %v446_v34  ;;  %v479_v48 = vadd.f32 %v463_v44, %v447_v35  ;;  %v453_v51 = vld [vmem:[%s2003_s29 + $0x8] sm:$0xff] }
  0xef   : > { %1209 = vmatmul.mubr.msk.bf16.vlgmr.msra.gmra.mrb[0].mxu1 %vm523_vm0, %v494_v24  ;;  %788 = vmatprep.subr.bf16.mxu0 %v1392_v5  ;;  %v491_v49 = vpack.c.bf16 %v451_v46, %v450_v45  ;;  %v464_v53 = vld [vmem:[%s2003_s29 + $0x60] sm:$0xff]  ;;  %v465_v54 = vld [vmem:[%s2003_s29 + $0x68] sm:$0xff]  ;;  %v468_v55 = vadd.f32 %v452_v50, %v2023_v7  ;;  %v469_v56 = vadd.f32 %v453_v51, %v2026_v8  ;;  %v454_v60 = vld [vmem:[%s2003_s29 + $0x10] sm:$0xff]  ;;  %v732_v8 = vlaneseq }
  0xf0   : > { %848 = vmatprep.mubr.bf16.mxu1 %v1693_v0  ;;  %v497_v52 = vpack.c.bf16 %v479_v48, %v478_v47  ;;  %v480_v57 = vadd.f32 %v464_v53, %v448_v38  ;;  %v481_v58 = vadd.f32 %v465_v54, %v449_v39  ;;  %v455_v61 = vld [vmem:[%s2003_s29 + $0x18] sm:$0xff]  ;;  %v466_v63 = vld [vmem:[%s2003_s29 + $0x70] sm:$0xff]  ;;  %v470_v2 = vadd.f32 %v454_v60, %v2031_v10 }
  0xf1   : > { %v492_v59 = vpack.c.bf16 %v469_v56, %v468_v55  ;;  %v467_v1 = vld [vmem:[%s2003_s29 + $0x78] sm:$0xff]  ;;  %v471_v3 = vadd.f32 %v455_v61, %v2034_v11  ;;  %v482_v4 = vadd.f32 %v466_v63, %v450_v45  ;;  %v733_v9 = vshrl.u32 %v732_v8, 7  ;;  %v730_v11 = vld [vmem:[#allocation11] sm:$0x3]  ;;  %v2093_v13 = vld [vmem:[#allocation8] ss:$0 sm:$0xff] }
  0xf2   : > { %789 = vmatpush1.bf16.msra.mxu0 %v1394_v6  ;;  %v498_v62 = vpack.c.bf16 %v481_v58, %v480_v57  ;;  %v483_v5 = vadd.f32 %v467_v1, %v451_v46 }
  0xf3   : > { %v493_v6 = vpack.c.bf16 %v471_v3, %v470_v2  ;;  %v734_v10 = vsub.s32 0, %v733_v9  ;;  %v738_v12 = vsub.s32 1, %v733_v9 }
  0xf4   : > { %v499_v7 = vpack.c.bf16 %v483_v5, %v482_v4 }
  0xf5   : > { %1274 = vmatmul.mubr.msk.bf16.gmra.mrb[4].mxu0 %vm523_vm0, %v487_v29  ;;  %v2097_v14 = vrot.slane %v730_v11, %v734_v10  ;;  %v2099_v16 = vrot.slane %v730_v11, %v738_v12 }
  0xf6   : > { %1277 = vmatprep.mubr.msk.bf16.mxu0 %vm523_vm0, %v488_v30 }
  0xf7   : > { %1210 = vmatmul.mubr.msk.bf16.gmra.mrb[4].mxu1 %vm523_vm0, %v495_v31 }
  0xf8   : > { %858 = vmatprep.mubr.bf16.mxu1 %v1693_v0 }
  0xfd   : > { %1278 = vmatmul.mubr.msk.bf16.gmra.mrb[8].mxu0 %vm523_vm0, %v489_v40 }
  0xfe   : > { %1281 = vmatprep.mubr.msk.bf16.mxu0 %vm523_vm0, %v490_v41 }
  0xff   : > { %1211 = vmatmul.mubr.msk.bf16.gmra.mrb[8].mxu1 %vm523_vm0, %v496_v42 }
 0x100   : > { %868 = vmatprep.mubr.bf16.mxu1 %v1693_v0 }
 0x105   : > { %1282 = vmatmul.mubr.msk.bf16.gmra.mrb[12].mxu0 %vm523_vm0, %v491_v49 }
 0x106   : > { %818 = vmatprep.mubr.bf16.mxu0 %v1693_v0 }
 0x107   : > { %1212 = vmatmul.mubr.msk.bf16.gmra.mrb[12].mxu1 %vm523_vm0, %v497_v52 }
 0x108   : > { %878 = vmatprep.mubr.bf16.mxu1 %v1693_v0 }
 0x10d   : > { %1207 = vmatmul.mubr.msk.bf16.vlgmr.msra.gmra.mrb[16].mxu0 %vm523_vm0, %v492_v59 }
 0x10e   : > { %828 = vmatprep.mubr.bf16.mxu0 %v1693_v0 }
 0x10f   : > { %1213 = vmatmul.mubr.msk.bf16.gmra.mrb[16].mxu1 %vm523_vm0, %v498_v62 }
 0x110   : > { %888 = vmatprep.mubr.bf16.mxu1 %v1693_v0 }
 0x115   : > { %1208 = vmatmul.mubr.msk.bf16.gmra.mrb[20].mxu0 %vm523_vm0, %v493_v6 }
 0x117   : > { %1214 = vmatmul.mubr.msk.bf16.gmra.mrb[20].mxu1 %vm523_vm0, %v499_v7 }
 0x1c0   : > { %v1271_v15 = vpop.f32.mrb[0].mxu0 }
 0x1c1   : > { %v591_v0 = vadd.f32 %v1271_v15, %v2093_v13  ;;  %v582_v17 = vpop.f32.mrb[1].mxu0 }
 0x1c2   : > { %v840_v18 = vpop.f32.mrb[0].mxu1  ;;  %v583_v19 = vadd.f32 %v2093_v13, %v582_v17  ;;  %v1272_v20 = vpop.f32.mrb[2].mxu0 }
 0x1c3   : > { %v1237_v21 = vpack.c.bf16 %v591_v0, %v591_v0  ;;  %v841_v22 = vadd.f32 %v840_v18, %v2097_v14  ;;  %v842_v23 = vpop.f32.mrb[1].mxu1  ;;  %v594_v24 = vadd.f32 %v1272_v20, %v2093_v13  ;;  %v585_v25 = vpop.f32.mrb[3].mxu0 }
 0x1c4   : > { %v1235_v26 = vpack.c.bf16 %v583_v19, %v583_v19  ;;  %v843_v27 = vadd.f32 %v842_v23, %v2099_v16  ;;  %v844_v28 = vpop.f32.mrb[2].mxu1  ;;  %v586_v29 = vadd.f32 %v2093_v13, %v585_v25 }
 0x1c5   : > { %712 = vst.msk [vmem:[%s2107_s23 + $0x8] sm:$0xf] %vm709_vm1, %v1237_v21  ;;  %907 = vst [vmem:[%s2111_s16 + $0x40] sm:$0xff] %v841_v22  ;;  %v1238_v30 = vpack.c.bf16 %v594_v24, %v594_v24  ;;  %v845_v31 = vadd.f32 %v844_v28, %v2097_v14  ;;  %v846_v32 = vpop.f32.mrb[3].mxu1 }
 0x1c6   : > { %710 = vst.msk [vmem:[%s2107_s23] sm:$0xf] %vm709_vm1, %v1235_v26  ;;  %908 = vst [vmem:[%s2111_s16 + $0x48] sm:$0xff] %v843_v27  ;;  %v1236_v33 = vpack.c.bf16 %v586_v29, %v586_v29  ;;  %v847_v34 = vadd.f32 %v846_v32, %v2099_v16 }
 0x1c7   : > { %713 = vst.msk [vmem:[%s2107_s23 + $0xc] sm:$0xf] %vm709_vm1, %v1238_v30  ;;  %909 = vst [vmem:[%s2111_s16 + $0x50] sm:$0xff] %v845_v31 }
 0x1c8   : > { %711 = vst.msk [vmem:[%s2107_s23 + $0x4] sm:$0xf] %vm709_vm1, %v1236_v33  ;;  %910 = vst [vmem:[%s2111_s16 + $0x58] sm:$0xff] %v847_v34  ;;  %v1275_v35 = vpop.f32.mrb[4].mxu0 }
 0x1c9   : > { %v607_v36 = vadd.f32 %v1275_v35, %v2093_v13  ;;  %v598_v37 = vpop.f32.mrb[5].mxu0 }
 0x1ca   : > { %v850_v38 = vpop.f32.mrb[4].mxu1  ;;  %v599_v39 = vadd.f32 %v2093_v13, %v598_v37  ;;  %v1276_v40 = vpop.f32.mrb[6].mxu0 }
 0x1cb   : > { %v1241_v41 = vpack.c.bf16 %v607_v36, %v607_v36  ;;  %v851_v42 = vadd.f32 %v850_v38, %v2097_v14  ;;  %v852_v43 = vpop.f32.mrb[5].mxu1  ;;  %v610_v44 = vadd.f32 %v1276_v40, %v2093_v13  ;;  %v601_v45 = vpop.f32.mrb[7].mxu0 }
 0x1cc   : > { %v1239_v46 = vpack.c.bf16 %v599_v39, %v599_v39  ;;  %v853_v47 = vadd.f32 %v852_v43, %v2099_v16  ;;  %v854_v48 = vpop.f32.mrb[6].mxu1  ;;  %v602_v49 = vadd.f32 %v2093_v13, %v601_v45 }
 0x1cd   : > { %716 = vst.msk [vmem:[%s2107_s23 + $0x18] sm:$0xf] %vm709_vm1, %v1241_v41  ;;  %911 = vst [vmem:[%s2111_s16 + $0x60] sm:$0xff] %v851_v42  ;;  %v1242_v50 = vpack.c.bf16 %v610_v44, %v610_v44  ;;  %v855_v51 = vadd.f32 %v854_v48, %v2097_v14  ;;  %v856_v52 = vpop.f32.mrb[7].mxu1 }
 0x1ce   : > { %714 = vst.msk [vmem:[%s2107_s23 + $0x10] sm:$0xf] %vm709_vm1, %v1239_v46  ;;  %912 = vst [vmem:[%s2111_s16 + $0x68] sm:$0xff] %v853_v47  ;;  %v1240_v53 = vpack.c.bf16 %v602_v49, %v602_v49  ;;  %v857_v54 = vadd.f32 %v856_v52, %v2099_v16 }
 0x1cf   : > { %717 = vst.msk [vmem:[%s2107_s23 + $0x1c] sm:$0xf] %vm709_vm1, %v1242_v50  ;;  %913 = vst [vmem:[%s2111_s16 + $0x70] sm:$0xff] %v855_v51 }
 0x1d0   : > { %715 = vst.msk [vmem:[%s2107_s23 + $0x14] sm:$0xf] %vm709_vm1, %v1240_v53  ;;  %914 = vst [vmem:[%s2111_s16 + $0x78] sm:$0xff] %v857_v54  ;;  %v1279_v55 = vpop.f32.mrb[8].mxu0 }
 0x1d1   : > { %v623_v56 = vadd.f32 %v1279_v55, %v2093_v13  ;;  %v614_v57 = vpop.f32.mrb[9].mxu0 }
 0x1d2   : > { %v860_v58 = vpop.f32.mrb[8].mxu1  ;;  %v615_v59 = vadd.f32 %v2093_v13, %v614_v57  ;;  %v1280_v60 = vpop.f32.mrb[10].mxu0 }
 0x1d3   : > { %v1245_v61 = vpack.c.bf16 %v623_v56, %v623_v56  ;;  %v861_v62 = vadd.f32 %v860_v58, %v2097_v14  ;;  %v862_v63 = vpop.f32.mrb[9].mxu1  ;;  %v626_v1 = vadd.f32 %v1280_v60, %v2093_v13  ;;  %v617_v2 = vpop.f32.mrb[11].mxu0 }
 0x1d4   : > { %v1243_v3 = vpack.c.bf16 %v615_v59, %v615_v59  ;;  %v863_v4 = vadd.f32 %v862_v63, %v2099_v16  ;;  %v864_v5 = vpop.f32.mrb[10].mxu1  ;;  %v618_v6 = vadd.f32 %v2093_v13, %v617_v2 }
 0x1d5   : > { %720 = vst.msk [vmem:[%s2107_s23 + $0x28] sm:$0xf] %vm709_vm1, %v1245_v61  ;;  %915 = vst [vmem:[%s2111_s16 + $0x80] sm:$0xff] %v861_v62  ;;  %v1246_v7 = vpack.c.bf16 %v626_v1, %v626_v1  ;;  %v865_v8 = vadd.f32 %v864_v5, %v2097_v14  ;;  %v866_v9 = vpop.f32.mrb[11].mxu1 }
 0x1d6   : > { %718 = vst.msk [vmem:[%s2107_s23 + $0x20] sm:$0xf] %vm709_vm1, %v1243_v3  ;;  %916 = vst [vmem:[%s2111_s16 + $0x88] sm:$0xff] %v863_v4  ;;  %v1244_v10 = vpack.c.bf16 %v618_v6, %v618_v6  ;;  %v867_v11 = vadd.f32 %v866_v9, %v2099_v16 }
 0x1d7   : > { %721 = vst.msk [vmem:[%s2107_s23 + $0x2c] sm:$0xf] %vm709_vm1, %v1246_v7  ;;  %917 = vst [vmem:[%s2111_s16 + $0x90] sm:$0xff] %v865_v8 }
 0x1d8   : > { %719 = vst.msk [vmem:[%s2107_s23 + $0x24] sm:$0xf] %vm709_vm1, %v1244_v10  ;;  %918 = vst [vmem:[%s2111_s16 + $0x98] sm:$0xff] %v867_v11  ;;  %v1283_v12 = vpop.f32.mrb[12].mxu0 }
 0x1d9   : > { %v639_v15 = vadd.f32 %v1283_v12, %v2093_v13  ;;  %v630_v0 = vpop.f32.mrb[13].mxu0 }
 0x1da   : > { %v870_v17 = vpop.f32.mrb[12].mxu1  ;;  %v631_v18 = vadd.f32 %v2093_v13, %v630_v0  ;;  %v1284_v19 = vpop.f32.mrb[14].mxu0 }
 0x1db   : > { %v1249_v20 = vpack.c.bf16 %v639_v15, %v639_v15  ;;  %v871_v21 = vadd.f32 %v870_v17, %v2097_v14  ;;  %v872_v22 = vpop.f32.mrb[13].mxu1  ;;  %v642_v23 = vadd.f32 %v1284_v19, %v2093_v13  ;;  %v633_v24 = vpop.f32.mrb[15].mxu0 }
 0x1dc   : > { %v1247_v25 = vpack.c.bf16 %v631_v18, %v631_v18  ;;  %v873_v26 = vadd.f32 %v872_v22, %v2099_v16  ;;  %v874_v27 = vpop.f32.mrb[14].mxu1  ;;  %v634_v28 = vadd.f32 %v2093_v13, %v633_v24 }
 0x1dd   : > { %724 = vst.msk [vmem:[%s2107_s23 + $0x38] sm:$0xf] %vm709_vm1, %v1249_v20  ;;  %919 = vst [vmem:[%s2111_s16 + $0xa0] sm:$0xff] %v871_v21  ;;  %v1250_v29 = vpack.c.bf16 %v642_v23, %v642_v23  ;;  %v875_v30 = vadd.f32 %v874_v27, %v2097_v14  ;;  %v876_v31 = vpop.f32.mrb[15].mxu1 }
 0x1de   : > { %722 = vst.msk [vmem:[%s2107_s23 + $0x30] sm:$0xf] %vm709_vm1, %v1247_v25  ;;  %920 = vst [vmem:[%s2111_s16 + $0xa8] sm:$0xff] %v873_v26  ;;  %v1248_v32 = vpack.c.bf16 %v634_v28, %v634_v28  ;;  %v877_v33 = vadd.f32 %v876_v31, %v2099_v16 }
 0x1df   : > { %725 = vst.msk [vmem:[%s2107_s23 + $0x3c] sm:$0xf] %vm709_vm1, %v1250_v29  ;;  %921 = vst [vmem:[%s2111_s16 + $0xb0] sm:$0xff] %v875_v30 }
 0x1e0   : > { %723 = vst.msk [vmem:[%s2107_s23 + $0x34] sm:$0xf] %vm709_vm1, %v1248_v32  ;;  %922 = vst [vmem:[%s2111_s16 + $0xb8] sm:$0xff] %v877_v33  ;;  %v820_v13 = vpop.f32.mrb[16].mxu0 }
 0x1e1   : > { %v821_v34 = vadd.f32 %v820_v13, %v2097_v14  ;;  %v822_v35 = vpop.f32.mrb[17].mxu0 }
 0x1e2   : > { %v880_v36 = vpop.f32.mrb[16].mxu1  ;;  %v823_v37 = vadd.f32 %v822_v35, %v2099_v16  ;;  %v824_v38 = vpop.f32.mrb[18].mxu0 }
 0x1e3   : > { %899 = vst [vmem:[%s2111_s16] sm:$0xff] %v821_v34  ;;  %v881_v39 = vadd.f32 %v880_v36, %v2097_v14  ;;  %v882_v40 = vpop.f32.mrb[17].mxu1  ;;  %v825_v41 = vadd.f32 %v824_v38, %v2097_v14  ;;  %v826_v42 = vpop.f32.mrb[19].mxu0 }
 0x1e4   : > { %900 = vst [vmem:[%s2111_s16 + $0x8] sm:$0xff] %v823_v37  ;;  %v883_v43 = vadd.f32 %v882_v40, %v2099_v16  ;;  %v884_v44 = vpop.f32.mrb[18].mxu1  ;;  %v827_v45 = vadd.f32 %v826_v42, %v2099_v16 }
 0x1e5   : > { %923 = vst [vmem:[%s2111_s16 + $0xc0] sm:$0xff] %v881_v39  ;;  %901 = vst [vmem:[%s2111_s16 + $0x10] sm:$0xff] %v825_v41  ;;  %v885_v46 = vadd.f32 %v884_v44, %v2097_v14  ;;  %v886_v47 = vpop.f32.mrb[19].mxu1 }
 0x1e6   : > { %924 = vst [vmem:[%s2111_s16 + $0xc8] sm:$0xff] %v883_v43  ;;  %902 = vst [vmem:[%s2111_s16 + $0x18] sm:$0xff] %v827_v45  ;;  %v887_v48 = vadd.f32 %v886_v47, %v2099_v16 }
 0x1e7   : > { %925 = vst [vmem:[%s2111_s16 + $0xd0] sm:$0xff] %v885_v46 }
 0x1e8   : > { %926 = vst [vmem:[%s2111_s16 + $0xd8] sm:$0xff] %v887_v48  ;;  %v830_v49 = vpop.f32.mrb[20].mxu0 }
 0x1e9   : > { %v831_v50 = vadd.f32 %v830_v49, %v2097_v14  ;;  %v832_v51 = vpop.f32.mrb[21].mxu0 }
 0x1ea   : > { %v890_v52 = vpop.f32.mrb[20].mxu1  ;;  %v833_v53 = vadd.f32 %v832_v51, %v2099_v16  ;;  %v834_v54 = vpop.f32.mrb[22].mxu0  ;;  %943 = sbr.rel (!%p2363_p7) target bundleno = 525 (0x20d), region = 72 }
 0x1eb   : > { %903 = vst [vmem:[%s2111_s16 + $0x20] sm:$0xff] %v831_v50  ;;  %v891_v55 = vadd.f32 %v890_v52, %v2097_v14  ;;  %v892_v56 = vpop.f32.mrb[21].mxu1  ;;  %v835_v57 = vadd.f32 %v834_v54, %v2097_v14  ;;  %v836_v58 = vpop.f32.mrb[23].mxu0 }
 0x1ec   : > { %904 = vst [vmem:[%s2111_s16 + $0x28] sm:$0xff] %v833_v53  ;;  %v893_v59 = vadd.f32 %v892_v56, %v2099_v16  ;;  %v894_v60 = vpop.f32.mrb[22].mxu1  ;;  %v837_v61 = vadd.f32 %v836_v58, %v2099_v16 }
 0x1ed   : > { %927 = vst [vmem:[%s2111_s16 + $0xe0] sm:$0xff] %v891_v55  ;;  %905 = vst [vmem:[%s2111_s16 + $0x30] sm:$0xff] %v835_v57  ;;  %v895_v62 = vadd.f32 %v894_v60, %v2097_v14  ;;  %v896_v63 = vpop.f32.mrb[23].mxu1 }
 0x1ee   : > { %928 = vst [vmem:[%s2111_s16 + $0xe8] sm:$0xff] %v893_v59  ;;  %906 = vst [vmem:[%s2111_s16 + $0x38] sm:$0xff] %v837_v61  ;;  %v897_v1 = vadd.f32 %v896_v63, %v2099_v16 }
 0x1ef   : > { %929 = vst [vmem:[%s2111_s16 + $0xf0] sm:$0xff] %v895_v62 }
 0x1f0   : > { %930 = vst [vmem:[%s2111_s16 + $0xf8] sm:$0xff] %v897_v1 }
 0x1f1   : > { %s2378_s24 = smov (!%p946_p8, %s945_s24), 16 }
 0x1f2   : > { %s2222_s10 = sshll.u32 %s2378_s24, 6 }
 0x1f3   : > { %s950_s20 = ssub.s32 1024, %s2222_s10 }
 0x1f4   : > { %951 = vsyncadd %s932_s3, %s950_s20  ;;  %p1219_p9 = scmp.ne.s32.totalorder %s2222_s10, 0  ;;  %s1251_s11 = sshll.u32 %s1761_s28, 10 }
 0x1f5   : > { %s2232_s21 = scalar_lea.hbm %s2331_s6, %s1251_s11  ;;  %s956_s22 = sshll.u32 %s2107_s23, 4  ;;  %s2235_s22 = int_to_ptr.vmem [resolvable:$true] %s956_s22 }
 0x1f6   : > { %s1563_s14 = scalar_lea.vmem %s2235_s22, %s2222_s10  ;;  %s1694_s15 = smov [#allocation13]  }
 0x1f7   : > { %p1564_p1 = scmp.ne.s32.totalorder %s2235_s22, %s1563_s14  ;;  %s1567_s29 = sshll.u32 %s1694_s15, 4  ;;  %s1568_s29 = int_to_ptr.vmem [resolvable:$false] %s1567_s29 }
 0x1f8   : > { %s1569_s12 = scalar_lea.vmem %s1568_s29, 2048  ;;  %p1570_p3 = scmp.lt.s32.totalorder %s2235_s22, %s1568_s29 }
 0x1f9   : > { %p1565_p2 = pnand %p1564_p1, %p1219_p9  ;;  %p1571_p0 = scmp.lt.s32.totalorder %s1569_s12, %s1563_s14 }
 0x1fb   : > { %p1566_p10 = pneg %p1565_p2  ;;  %p1572_p6 = por %p1571_p0, %p1570_p3 }
 0x1fd   : > { %p1573_p5 = pnand %p1572_p6, %p1566_p10 }
 0x1ff   : > { %1576 = shalt.err (!%p1573_p5)
}
 0x200   : > { %s1577_s19 = scalar_lea.hbm %s2232_s21, %s2222_s10  ;;  %s1581_s24 = scalar_lea.hbm %s2331_s6, 1280 }
 0x201   : > { %p1578_p12 = scmp.ne.s32.totalorder %s2232_s21, %s1577_s19  ;;  %p1582_p7 = scmp.lt.u32.totalorder %s2232_s21, %s2331_s6 }
 0x202   : > { %p1583_p8 = scmp.lt.u32.totalorder %s1581_s24, %s1577_s19  ;;  %p1585_p2 = scmp.lt.u32.totalorder %s1577_s19, %s2232_s21 }
 0x203   : > { %p1579_p13 = pnand %p1578_p12, %p1219_p9 }
 0x204   : > { %p1584_p1 = por %p1583_p8, %p1582_p7 }
 0x205   : > { %p1580_p11 = pneg %p1579_p13 }
 0x206   : > { %p1586_p10 = por %p1585_p2, %p1584_p1 }
 0x208   : > { %p1587_p3 = pnand %p1586_p10, %p1580_p11 }
 0x20a   : > { %1590 = shalt.err (!%p1587_p3)
}
 0x20b   : > { %s1695_s8 = smov 64   ;;  %s1696_s18 = smov 4  }
 0x20c   : > { %962 = dma.vmem_to_hbm [thread:$0]  (%p1219_p9), %s2235_s22, %s2222_s10, %s2232_s21, %s932_s3, %s1695_s8, %s1695_s8, %s1696_s18  }
 0x20d PF: > { %p2364_p0 = scmp.ne.s32.totalorder %s2346_s13, 0 }
 0x20e   : > { %s1223_s14 = sshll.u32 (%p2364_p0), %s1761_s28, 4 }
 0x20f   : > { %965 = sbr.rel (!%p2364_p0) target bundleno = 562 (0x232), region = 76  ;;  %s967_s15 = ssub.s32 (%p2364_p0), 20, %s1223_s14 }
 0x210   : > { %p968_p6 = scmp.lt.s32.totalorder (%p2364_p0), %s967_s15, 16 }
 0x216   : > { %s2380_s15 = smov (!%p968_p6, %s967_s15), 16 }
 0x217   : > { %s2266_s29 = sshll.u32 %s2380_s15, 8 }
 0x218   : > { %s973_s12 = ssub.s32 4096, %s2266_s29 }
 0x219   : > { %974 = vsyncadd %s937_s30, %s973_s12  ;;  %p1226_p9 = scmp.ne.s32.totalorder %s2266_s29, 0  ;;  %s1254_s13 = sshll.u32 %s1761_s28, 12 }
 0x21a   : > { %s2276_s21 = scalar_lea.hbm %s2332_s7, %s1254_s13  ;;  %s980_s22 = sshll.u32 %s2111_s16, 4  ;;  %s2279_s22 = int_to_ptr.vmem [resolvable:$true] %s980_s22 }
 0x21b   : > { %s1591_s19 = scalar_lea.vmem %s2279_s22, %s2266_s29  ;;  %s1697_s23 = smov [#allocation14]  }
 0x21c   : > { %p1592_p5 = scmp.ne.s32.totalorder %s2279_s22, %s1591_s19  ;;  %s1595_s9 = sshll.u32 %s1697_s23, 4  ;;  %s1596_s9 = int_to_ptr.vmem [resolvable:$false] %s1595_s9 }
 0x21d   : > { %s1597_s28 = scalar_lea.vmem %s1596_s9, 8192  ;;  %p1598_p11 = scmp.lt.s32.totalorder %s2279_s22, %s1596_s9 }
 0x21e   : > { %p1593_p12 = pnand %p1592_p5, %p1226_p9  ;;  %p1599_p7 = scmp.lt.s32.totalorder %s1597_s28, %s1591_s19 }
 0x220   : > { %p1594_p13 = pneg %p1593_p12  ;;  %p1600_p8 = por %p1599_p7, %p1598_p11 }
 0x222   : > { %p1601_p1 = pnand %p1600_p8, %p1594_p13 }
 0x224   : > { %1604 = shalt.err (!%p1601_p1)
}
 0x225   : > { %s1605_s16 = scalar_lea.hbm %s2276_s21, %s2266_s29  ;;  %s1609_s11 = scalar_lea.hbm %s2332_s7, 5120 }
 0x226   : > { %p1606_p2 = scmp.ne.s32.totalorder %s2276_s21, %s1605_s16  ;;  %p1610_p0 = scmp.lt.u32.totalorder %s2276_s21, %s2332_s7 }
 0x227   : > { %p1611_p6 = scmp.lt.u32.totalorder %s1609_s11, %s1605_s16  ;;  %p1613_p12 = scmp.lt.u32.totalorder %s1605_s16, %s2276_s21 }
 0x228   : > { %p1607_p10 = pnand %p1606_p2, %p1226_p9 }
 0x229   : > { %p1612_p5 = por %p1611_p6, %p1610_p0 }
 0x22a   : > { %p1608_p3 = pneg %p1607_p10 }
 0x22b   : > { %p1614_p13 = por %p1613_p12, %p1612_p5 }
 0x22d   : > { %p1615_p11 = pnand %p1614_p13, %p1608_p3 }
 0x22f   : > { %1618 = shalt.err (!%p1615_p11)
}
 0x230   : > { %s1698_s14 = smov 256   ;;  %s1699_s15 = smov 16  }
 0x231   : > { %986 = dma.vmem_to_hbm [thread:$0]  (%p1226_p9), %s2279_s22, %s2266_s29, %s2276_s21, %s937_s30, %s1698_s14, %s1698_s14, %s1699_s15  }
 0x232 PF: > { %s2365_s12 = sld [smem:[#allocation23_spill]]  ;;  %s2366_s13 = sld [smem:[#allocation26_spill]] }
 0x238   : > { %s995_s3 = sand.u32 1, %s2365_s12   ;;  %p2367_p7 = scmp.ne.s32.totalorder %s2366_s13, 0 }
 0x239   : > { %s996_s10 = scalar_lea.sflag [#allocation4], %s995_s3 }
 0x23a   : > { %p1323_p8 = pnand %p1152_p4, %p2367_p7 }
 0x23c   : > { %1656 = dma.done.wait (!%p1323_p8), %s996_s10, 1024  }
 0x23d   : > { %1658 = vsyncadd (!%p1323_p8), %s996_s10, 4294966272  ;;  %s1005_s19 = scalar_lea.sflag [#allocation15], %s995_s3 }
 0x23e   : > { %1660 = dma.done.wait (!%p1323_p8), %s1005_s19, 4096  }
 0x23f   : > { %1662 = vsyncadd (!%p1323_p8), %s1005_s19, 4294963200  ;;  %s2368_s27 = sld [smem:[#allocation24_spill]]  ;;  %s2369_s17 = sld [smem:[#allocation25_spill]] }
 0x240   : > { %s2370_s24 = smov %s1669_s25  ;;  %s2371_s25 = smov %s1673_s26 }
 0x245   : > { %p29_p9 = scmp.ge.s32.totalorder %s2368_s27, 4   ;;  %s2372_s26 = smov %s2369_s17 }
 0x247   :  { %31 = sbr.rel (!%p29_p9) target bundleno = 13 (0xd), region = 135 }
 0x24e   :  { %1010 = vsyncpa [#allocation3], 1 }
 0x24f   :  { %1012 = vsyncpa [#allocation3 + $0x1], 1 }
 0x250   :  { %1013 = vsyncpa [#allocation6], 1 }
 0x251   :  { %1015 = vsyncpa [#allocation6 + $0x1], 1 }
 0x252   :  { %1016 = vsyncpa [#allocation9], 1 }
 0x253   :  { %1017 = vsyncpa [#allocation12], 1 }
 0x254   :  { %1018 = vsyncpa [#allocation4], 1 }
 0x255   :  { %1020 = vsyncpa [#allocation4 + $0x1], 1 }
 0x256   :  { %1021 = vsyncpa [#allocation15], 1 }
 0x257   :  { %1023 = vsyncpa [#allocation15 + $0x1], 1 }

</bundles_post_ra>
